<compile_context>
chip_gen: v7x
topology: tpu7x:2x2x1
jax: 0.10.0
libtpu: 0.0.40
codegen_flags: <defaults>
</compile_context>

<pallas_src>
import numpy as np

import jax
import jax.numpy as jnp
from jax.experimental import pallas as pl
from jax.experimental.pallas import tpu as pltpu


# -----------------------------------------------------------------------------
# Model configuration (synthetic heterogeneous graph)
# -----------------------------------------------------------------------------

PRIMITIVES = ["one-hot", "adj_agg", "adj2_agg"]   # 'one-hot' + 2 graph-agg stand-ins
NUM_OPS = len(PRIMITIVES)
ONE_HOT_IDX = PRIMITIVES.index("one-hot")

NODE_TYPE_COUNTS = [6, 5, 5]          # dl.nodes['count']
NUM_TYPES = len(NODE_TYPE_COUNTS)
VALID_ATTR_NODE_TYPE = 0              # args.valid_attributed_type
INITIAL_DIM = 8                       # in_dims[valid_attr_node_type]
ATT_COMP_DIM = 32                     # args.att_comp_dim
HIDDEN_DIM = 64                       # args.hidden_dim (useTypeLinear=True)

ALL_NODES_NUM = sum(NODE_TYPE_COUNTS)
TYPE_SHIFTS = np.concatenate([[0], np.cumsum(NODE_TYPE_COUNTS)])  # type start offsets
ATTR_START = int(TYPE_SHIFTS[VALID_ATTR_NODE_TYPE])
ATTR_END = int(TYPE_SHIFTS[VALID_ATTR_NODE_TYPE + 1])
UNATTR_IDS = np.array(
    [i for i in range(ALL_NODES_NUM) if not (ATTR_START <= i < ATTR_END)]
)
UNATTR_NUM = len(UNATTR_IDS)


# -----------------------------------------------------------------------------
# Fused Pallas kernel: entire forward in one invocation, all VMEM resident
# -----------------------------------------------------------------------------

def _fused_forward_kernel(
    feat_ref,      # (N, INITIAL_DIM+1)  zero-padded features | attributed indicator
    wpre_ref,      # (INITIAL_DIM+1, D)  [w_pre ; b_pre]  (augmented-K)
    adj_ref,       # (N, N)              dense adjacency
    comb_ref,      # (3, N, D)           [relu(a_adj), relu(a_adj2), const]  pre-masked
    wfc_ref,       # (T, D+1, H)         per-type [w_fc ; b_fc]  (augmented-K)
    h_attr_ref,    # out: (N, D)
    h_tr_ref,      # out: (N, H)
):
    n, d = h_attr_ref.shape
    h = h_tr_ref.shape[1]

    # 1) preprocess Linear, scattered into h0 -- computed directly as a value:
    #    padded feature rows are exactly zero outside the attributed range and
    #    the trailing indicator column selects the bias row of wpre.
    h0 = jnp.dot(feat_ref[...], wpre_ref[...], preferred_element_type=jnp.float32)

    # 2/3) shared graph-aggregation ops; the 1-hop result never leaves vregs.
    adj = adj_ref[...]
    h_adj = jnp.dot(adj, h0, preferred_element_type=jnp.float32)
    h_adj2 = jnp.dot(adj, h_adj, preferred_element_type=jnp.float32)

    # 4) MixedOpShared combine + h0 residual.  All h0-independent terms
    #    (one-hot op * relu(alpha), sum of non-positive alphas, un-attributed
    #    row mask) are prefolded into comb_ref[2] by the wrapper; the positive
    #    alphas for the adjacency ops arrive pre-broadcast to (N, D).
    h_att = comb_ref[0] * h_adj + comb_ref[1] * h_adj2 + comb_ref[2] + h0
    h_attr_ref[...] = h_att

    # 5) args.useTypeLinear: per-type Linear via masked matmul-accumulate,
    #    lane-dense row masks from iota, one full-width store.
    row = jax.lax.broadcasted_iota(jnp.int32, (n, h), 0)
    h_tr = jnp.zeros((n, h), jnp.float32)
    for t in range(NUM_TYPES):                      # tiny static unrolled loop
        s, e = int(TYPE_SHIFTS[t]), int(TYPE_SHIFTS[t + 1])
        mask_t = jnp.where((row >= s) & (row < e), 1.0, 0.0)       # (n, h)
        w_slab = wfc_ref[t]                                        # (D+1, h)
        w_t = w_slab[:ATT_COMP_DIM, :]                             # (D, h)
        b_t = w_slab[ATT_COMP_DIM:ATT_COMP_DIM + 1, :]             # (1, h)
        h_tr = h_tr + mask_t * (
            jnp.dot(h_att, w_t, preferred_element_type=jnp.float32) + b_t
        )
    h_tr_ref[...] = h_tr


def _vmem_spec():
    return pl.BlockSpec(memory_space=pltpu.MemorySpace.VMEM)


def fused_forward(feat_aug, w_pre_aug, adjM, combine, w_fc_aug):
    n, d = ALL_NODES_NUM, ATT_COMP_DIM
    return pl.pallas_call(
        _fused_forward_kernel,
        out_shape=(
            jax.ShapeDtypeStruct((n, d), jnp.float32),
            jax.ShapeDtypeStruct((n, HIDDEN_DIM), jnp.float32),
        ),
        in_specs=[_vmem_spec() for _ in range(5)],
        out_specs=(_vmem_spec(), _vmem_spec()),
    )(feat_aug, w_pre_aug, adjM, combine, w_fc_aug)


# -----------------------------------------------------------------------------
# Parameter init (mirrors xavier_normal_(gain=1.414) linears of the module)
# -----------------------------------------------------------------------------

def xavier_normal(key, fan_in, fan_out, gain=1.414):
    std = gain * np.sqrt(2.0 / (fan_in + fan_out))
    return std * jax.random.normal(key, (fan_in, fan_out), dtype=jnp.float32)


def init_params(key):
    keys = jax.random.split(key, 16)
    params = {}
    # preprocess : Linear(initial_dim -> att_comp_dim)
    params["w_pre"] = xavier_normal(keys[0], INITIAL_DIM, ATT_COMP_DIM)
    params["b_pre"] = 0.01 * jax.random.normal(keys[1], (1, ATT_COMP_DIM), jnp.float32)
    # embedding_list : one Linear(type_count -> att_comp_dim) per non-attributed type
    params["w_emb"], params["b_emb"] = {}, {}
    k = 2
    for t in range(NUM_TYPES):
        if t == VALID_ATTR_NODE_TYPE:
            continue
        dim = NODE_TYPE_COUNTS[t]
        params["w_emb"][t] = xavier_normal(keys[k], dim, ATT_COMP_DIM); k += 1
        params["b_emb"][t] = 0.01 * jax.random.normal(keys[k], (1, ATT_COMP_DIM)); k += 1
    # fc_list : Linear(att_comp_dim -> hidden_dim) per node type (useTypeLinear)
    params["w_fc"], params["b_fc"] = {}, {}
    for t in range(NUM_TYPES):
        params["w_fc"][t] = xavier_normal(keys[k], ATT_COMP_DIM, HIDDEN_DIM); k += 1
        params["b_fc"][t] = 0.01 * jax.random.normal(keys[k], (1, HIDDEN_DIM)); k += 1
    return params


# -----------------------------------------------------------------------------
# Forward pass: layout / constant folding in JAX, all compute in the fused kernel
# -----------------------------------------------------------------------------

def network_nasp_allnodes_forward(params, features_attr, adjM, alphas):
    N, D, P, T = ALL_NODES_NUM, ATT_COMP_DIM, NUM_OPS, NUM_TYPES

    # 'one-hot' primitive: embedding Linear applied to an identity matrix is
    # literally (W + b) per type, so the identity matmuls are removed entirely.
    one_hot_parts = []
    for t in range(T):
        cnt = NODE_TYPE_COUNTS[t]
        if t == VALID_ATTR_NODE_TYPE:
            one_hot_parts.append(jnp.zeros((cnt, D), jnp.float32))
        else:
            one_hot_parts.append(params["w_emb"][t] + params["b_emb"][t])
    one_hot_h = jnp.concatenate(one_hot_parts, axis=0)            # (N, D)

    # arch weights: zero on attributed rows (those rows never go through the
    # mixed op), split into positive / non-positive parts.
    alpha_full = jnp.zeros((N, P), jnp.float32).at[UNATTR_IDS].set(alphas)
    a_pos = jnp.maximum(alpha_full, 0.0)                          # "alpha > 0" branch
    a_negsum = jnp.sum(jnp.minimum(alpha_full, 0.0), axis=1, keepdims=True)

    # All h0-independent combine terms folded into one (N, D) constant; the
    # remaining positive alphas (adjacency ops) are pre-broadcast to (N, D)
    # so the kernel sees full-vreg lane-dense operands.
    const = a_pos[:, ONE_HOT_IDX:ONE_HOT_IDX + 1] * one_hot_h + a_negsum
    adj_op_cols = [i for i in range(P) if i != ONE_HOT_IDX]       # PRIMITIVES order
    a1_b = jnp.broadcast_to(a_pos[:, adj_op_cols[0]:adj_op_cols[0] + 1], (N, D))
    a2_b = jnp.broadcast_to(a_pos[:, adj_op_cols[1]:adj_op_cols[1] + 1], (N, D))
    combine = jnp.stack([a1_b, a2_b, const], axis=0)              # (3, N, D)

    # preprocess inputs: zero-padded features + attributed-row indicator column,
    # bias folded into the weight as an extra row (augmented-K).
    feat_pad = jnp.zeros((N, INITIAL_DIM), jnp.float32).at[
        ATTR_START:ATTR_END].set(features_attr)
    attr_ind = jnp.zeros((N, 1), jnp.float32).at[ATTR_START:ATTR_END].set(1.0)
    feat_aug = jnp.concatenate([feat_pad, attr_ind], axis=1)      # (N, INITIAL_DIM+1)
    w_pre_aug = jnp.concatenate([params["w_pre"], params["b_pre"]], axis=0)

    # per-type fc weights with bias folded as last row, stacked on leading axis.
    w_fc_aug = jnp.stack(
        [jnp.concatenate([params["w_fc"][t], params["b_fc"][t]], axis=0)
         for t in range(T)], axis=0)                              # (T, D+1, H)

    return fused_forward(feat_aug, w_pre_aug, adjM, combine, w_fc_aug)


# -----------------------------------------------------------------------------
# Pure-JAX reference (mirrors the PyTorch forward) for a correctness check
# -----------------------------------------------------------------------------

def reference_forward(params, features_attr, adjM, alphas):
    N, D, P = ALL_NODES_NUM, ATT_COMP_DIM, NUM_OPS
    attributed_ids = np.arange(ATTR_START, ATTR_END)

    h_pre = features_attr @ params["w_pre"] + params["b_pre"]
    h0 = jnp.zeros((N, D), jnp.float32).at[attributed_ids].set(h_pre)

    one_hot_parts = []
    for t in range(NUM_TYPES):
        cnt = NODE_TYPE_COUNTS[t]
        if t == VALID_ATTR_NODE_TYPE:
            one_hot_parts.append(jnp.zeros((cnt, D), jnp.float32))
        else:
            eye = jnp.eye(cnt, dtype=jnp.float32)
            one_hot_parts.append(eye @ params["w_emb"][t] + params["b_emb"][t])
    one_hot_h = jnp.concatenate(one_hot_parts, axis=0)

    h_adj = adjM @ h0
    h_adj2 = adjM @ h_adj
    h_ops = [one_hot_h, h_adj, h_adj2]

    alpha_full = jnp.zeros((N, P), jnp.float32).at[UNATTR_IDS].set(alphas)
    mask = jnp.zeros((N, 1), jnp.float32).at[UNATTR_IDS].set(1.0)
    acc = jnp.zeros((N, D), jnp.float32)
    for i in range(P):
        a = alpha_full[:, i:i + 1]
        acc = acc + jnp.where(a > 0.0, a * h_ops[i], a)
    h_att = mask * acc + h0

    parts = []
    for t in range(NUM_TYPES):
        s, e = int(TYPE_SHIFTS[t]), int(TYPE_SHIFTS[t + 1])
        parts.append(h_att[s:e] @ params["w_fc"][t] + params["b_fc"][t])
    h_tr = jnp.concatenate(parts, axis=0)
    return h_att, h_tr


# -----------------------------------------------------------------------------
# Main
# -----------------------------------------------------------------------------

if __name__ == "__main__":
    key = jax.random.PRNGKey(0)
    k_param, k_feat, k_adj = jax.random.split(key, 3)

    params = init_params(k_param)

    # features_list[valid_attr_node_type]: raw attributed features (6, 8)
    features_attr = jax.random.normal(
        k_feat, (NODE_TYPE_COUNTS[VALID_ATTR_NODE_TYPE], INITIAL_DIM), jnp.float32
    )

    # dense adjacency matrix stand-in for g.adjacency_matrix()  (16, 16)
    adjM = (
        jax.random.bernoulli(k_adj, 0.3, (ALL_NODES_NUM, ALL_NODES_NUM))
        .astype(jnp.float32)
    )
    adjM = adjM + jnp.eye(ALL_NODES_NUM, dtype=jnp.float32)       # self loops

    # arch parameters: alphas = ones(unAttributed_nodes_num, num_ops) / 2
    alphas = jnp.ones((UNATTR_NUM, NUM_OPS), jnp.float32) / 2.0

    h_attributed, h_transform = network_nasp_allnodes_forward(
        params, features_attr, adjM, alphas
    )
    jax.block_until_ready((h_attributed, h_transform))

    # correctness check against the pure-JAX reference of the module forward
    h_att_ref, h_tr_ref = reference_forward(params, features_attr, adjM, alphas)
    assert h_attributed.shape == (ALL_NODES_NUM, ATT_COMP_DIM)
    assert h_transform.shape == (ALL_NODES_NUM, HIDDEN_DIM)
    assert bool(jnp.all(jnp.isfinite(h_attributed)))
    assert bool(jnp.all(jnp.isfinite(h_transform)))
    assert bool(jnp.allclose(h_attributed, h_att_ref, rtol=1e-5, atol=1e-5))
    assert bool(jnp.allclose(h_transform, h_tr_ref, rtol=1e-5, atol=1e-5))

    print("KERNEL_OK")
</pallas_src>

<mosaic_0001>
module attributes {stable_mosaic.version = 11 : i64} {
  func.func @_fused_forward_kernel(%arg0: memref<16x9xf32, #tpu.memory_space<vmem>>, %arg1: memref<9x32xf32, #tpu.memory_space<vmem>>, %arg2: memref<16x16xf32, #tpu.memory_space<vmem>>, %arg3: memref<3x16x32xf32, #tpu.memory_space<vmem>>, %arg4: memref<3x33x64xf32, #tpu.memory_space<vmem>>, %arg5: memref<16x32xf32, #tpu.memory_space<vmem>>, %arg6: memref<16x64xf32, #tpu.memory_space<vmem>>) attributes {dimension_semantics = [], scalar_prefetch = 0 : i64, scratch_operands = 0 : i64, tpu.core_type = #tpu.core_type<tc>} {
    %c0 = arith.constant 0 : index
    %c0_0 = arith.constant 0 : index
    %0 = vector.load %arg0[%c0, %c0_0] : memref<16x9xf32, #tpu.memory_space<vmem>>, vector<16x9xf32>
    %c0_1 = arith.constant 0 : index
    %c0_2 = arith.constant 0 : index
    %1 = vector.load %arg1[%c0_1, %c0_2] : memref<9x32xf32, #tpu.memory_space<vmem>>, vector<9x32xf32>
    %cst = arith.constant dense<0.000000e+00> : vector<16x32xf32>
    %2 = tpu.matmul %0, %1, %cst {dimension_numbers = #tpu.dot_dimension_numbers<[1], [0], [0], [1], [0, 0, 1, 1], [], []>} : vector<16x9xf32>, vector<9x32xf32>, vector<16x32xf32> -> vector<16x32xf32>
    %c0_3 = arith.constant 0 : index
    %c0_4 = arith.constant 0 : index
    %3 = vector.load %arg2[%c0_3, %c0_4] : memref<16x16xf32, #tpu.memory_space<vmem>>, vector<16x16xf32>
    %cst_5 = arith.constant dense<0.000000e+00> : vector<16x32xf32>
    %4 = tpu.matmul %3, %2, %cst_5 {dimension_numbers = #tpu.dot_dimension_numbers<[1], [0], [0], [1], [0, 0, 1, 1], [], []>} : vector<16x16xf32>, vector<16x32xf32>, vector<16x32xf32> -> vector<16x32xf32>
    %cst_6 = arith.constant dense<0.000000e+00> : vector<16x32xf32>
    %5 = tpu.matmul %3, %4, %cst_6 {dimension_numbers = #tpu.dot_dimension_numbers<[1], [0], [0], [1], [0, 0, 1, 1], [], []>} : vector<16x16xf32>, vector<16x32xf32>, vector<16x32xf32> -> vector<16x32xf32>
    %c0_7 = arith.constant 0 : index
    %c0_8 = arith.constant 0 : index
    %c0_9 = arith.constant 0 : index
    %6 = vector.load %arg3[%c0_7, %c0_8, %c0_9] : memref<3x16x32xf32, #tpu.memory_space<vmem>>, vector<1x16x32xf32>
    %7 = vector.shape_cast %6 : vector<1x16x32xf32> to vector<16x32xf32>
    %8 = arith.mulf %7, %4 : vector<16x32xf32>
    %c1 = arith.constant 1 : index
    %c0_10 = arith.constant 0 : index
    %c0_11 = arith.constant 0 : index
    %9 = vector.load %arg3[%c1, %c0_10, %c0_11] : memref<3x16x32xf32, #tpu.memory_space<vmem>>, vector<1x16x32xf32>
    %10 = vector.shape_cast %9 : vector<1x16x32xf32> to vector<16x32xf32>
    %11 = arith.mulf %10, %5 : vector<16x32xf32>
    %12 = arith.addf %8, %11 : vector<16x32xf32>
    %c2 = arith.constant 2 : index
    %c0_12 = arith.constant 0 : index
    %c0_13 = arith.constant 0 : index
    %13 = vector.load %arg3[%c2, %c0_12, %c0_13] : memref<3x16x32xf32, #tpu.memory_space<vmem>>, vector<1x16x32xf32>
    %14 = vector.shape_cast %13 : vector<1x16x32xf32> to vector<16x32xf32>
    %15 = arith.addf %12, %14 : vector<16x32xf32>
    %16 = arith.addf %15, %2 : vector<16x32xf32>
    %c0_14 = arith.constant 0 : index
    %c0_15 = arith.constant 0 : index
    %17 = vector.load %arg5[%c0_14, %c0_15] : memref<16x32xf32, #tpu.memory_space<vmem>>, vector<16x32xf32>
    tpu.vector_store %arg5[%c0_14, %c0_15], %16 {strides = array<i32>} : memref<16x32xf32, #tpu.memory_space<vmem>>, vector<16x32xf32>,
    %18 = tpu.iota {dimensions = array<i32: 0>} : vector<16x64xi32>
    %cst_16 = arith.constant 0.000000e+00 : f32
    %19 = vector.broadcast %cst_16 : f32 to vector<16x64xf32>
    %c0_i32 = arith.constant 0 : i32
    %20 = vector.broadcast %c0_i32 : i32 to vector<16x64xi32>
    %21 = arith.cmpi sge, %18, %20 : vector<16x64xi32>
    %c6_i32 = arith.constant 6 : i32
    %22 = vector.broadcast %c6_i32 : i32 to vector<16x64xi32>
    %23 = arith.cmpi slt, %18, %22 : vector<16x64xi32>
    %24 = arith.andi %21, %23 : vector<16x64xi1>
    %cst_17 = arith.constant 1.000000e+00 : f32
    %cst_18 = arith.constant 0.000000e+00 : f32
    %25 = vector.broadcast %cst_17 : f32 to vector<16x64xf32>
    %26 = vector.broadcast %cst_18 : f32 to vector<16x64xf32>
    %27 = arith.select %24, %25, %26 : vector<16x64xi1>, vector<16x64xf32>
    %c0_19 = arith.constant 0 : index
    %c0_20 = arith.constant 0 : index
    %c0_21 = arith.constant 0 : index
    %28 = vector.load %arg4[%c0_19, %c0_20, %c0_21] : memref<3x33x64xf32, #tpu.memory_space<vmem>>, vector<1x33x64xf32>
    %29 = vector.shape_cast %28 : vector<1x33x64xf32> to vector<33x64xf32>
    %30 = vector.extract_strided_slice %29 {offsets = [0, 0], sizes = [32, 64], strides = [1, 1]} : vector<33x64xf32> to vector<32x64xf32>
    %31 = vector.extract_strided_slice %29 {offsets = [32, 0], sizes = [1, 64], strides = [1, 1]} : vector<33x64xf32> to vector<1x64xf32>
    %cst_22 = arith.constant dense<0.000000e+00> : vector<16x64xf32>
    %32 = tpu.matmul %16, %30, %cst_22 {dimension_numbers = #tpu.dot_dimension_numbers<[1], [0], [0], [1], [0, 0, 1, 1], [], []>} : vector<16x32xf32>, vector<32x64xf32>, vector<16x64xf32> -> vector<16x64xf32>
    %33 = vector.broadcast %31 : vector<1x64xf32> to vector<16x64xf32>
    %34 = arith.addf %32, %33 : vector<16x64xf32>
    %35 = arith.mulf %27, %34 : vector<16x64xf32>
    %36 = arith.addf %19, %35 : vector<16x64xf32>
    %c6_i32_23 = arith.constant 6 : i32
    %37 = vector.broadcast %c6_i32_23 : i32 to vector<16x64xi32>
    %38 = arith.cmpi sge, %18, %37 : vector<16x64xi32>
    %c11_i32 = arith.constant 11 : i32
    %39 = vector.broadcast %c11_i32 : i32 to vector<16x64xi32>
    %40 = arith.cmpi slt, %18, %39 : vector<16x64xi32>
    %41 = arith.andi %38, %40 : vector<16x64xi1>
    %cst_24 = arith.constant 1.000000e+00 : f32
    %cst_25 = arith.constant 0.000000e+00 : f32
    %42 = vector.broadcast %cst_24 : f32 to vector<16x64xf32>
    %43 = vector.broadcast %cst_25 : f32 to vector<16x64xf32>
    %44 = arith.select %41, %42, %43 : vector<16x64xi1>, vector<16x64xf32>
    %c1_26 = arith.constant 1 : index
    %c0_27 = arith.constant 0 : index
    %c0_28 = arith.constant 0 : index
    %45 = vector.load %arg4[%c1_26, %c0_27, %c0_28] : memref<3x33x64xf32, #tpu.memory_space<vmem>>, vector<1x33x64xf32>
    %46 = vector.shape_cast %45 : vector<1x33x64xf32> to vector<33x64xf32>
    %47 = vector.extract_strided_slice %46 {offsets = [0, 0], sizes = [32, 64], strides = [1, 1]} : vector<33x64xf32> to vector<32x64xf32>
    %48 = vector.extract_strided_slice %46 {offsets = [32, 0], sizes = [1, 64], strides = [1, 1]} : vector<33x64xf32> to vector<1x64xf32>
    %cst_29 = arith.constant dense<0.000000e+00> : vector<16x64xf32>
    %49 = tpu.matmul %16, %47, %cst_29 {dimension_numbers = #tpu.dot_dimension_numbers<[1], [0], [0], [1], [0, 0, 1, 1], [], []>} : vector<16x32xf32>, vector<32x64xf32>, vector<16x64xf32> -> vector<16x64xf32>
    %50 = vector.broadcast %48 : vector<1x64xf32> to vector<16x64xf32>
    %51 = arith.addf %49, %50 : vector<16x64xf32>
    %52 = arith.mulf %44, %51 : vector<16x64xf32>
    %53 = arith.addf %36, %52 : vector<16x64xf32>
    %c11_i32_30 = arith.constant 11 : i32
    %54 = vector.broadcast %c11_i32_30 : i32 to vector<16x64xi32>
    %55 = arith.cmpi sge, %18, %54 : vector<16x64xi32>
    %c16_i32 = arith.constant 16 : i32
    %56 = vector.broadcast %c16_i32 : i32 to vector<16x64xi32>
    %57 = arith.cmpi slt, %18, %56 : vector<16x64xi32>
    %58 = arith.andi %55, %57 : vector<16x64xi1>
    %cst_31 = arith.constant 1.000000e+00 : f32
    %cst_32 = arith.constant 0.000000e+00 : f32
    %59 = vector.broadcast %cst_31 : f32 to vector<16x64xf32>
    %60 = vector.broadcast %cst_32 : f32 to vector<16x64xf32>
    %61 = arith.select %58, %59, %60 : vector<16x64xi1>, vector<16x64xf32>
    %c2_33 = arith.constant 2 : index
    %c0_34 = arith.constant 0 : index
    %c0_35 = arith.constant 0 : index
    %62 = vector.load %arg4[%c2_33, %c0_34, %c0_35] : memref<3x33x64xf32, #tpu.memory_space<vmem>>, vector<1x33x64xf32>
    %63 = vector.shape_cast %62 : vector<1x33x64xf32> to vector<33x64xf32>
    %64 = vector.extract_strided_slice %63 {offsets = [0, 0], sizes = [32, 64], strides = [1, 1]} : vector<33x64xf32> to vector<32x64xf32>
    %65 = vector.extract_strided_slice %63 {offsets = [32, 0], sizes = [1, 64], strides = [1, 1]} : vector<33x64xf32> to vector<1x64xf32>
    %cst_36 = arith.constant dense<0.000000e+00> : vector<16x64xf32>
    %66 = tpu.matmul %16, %64, %cst_36 {dimension_numbers = #tpu.dot_dimension_numbers<[1], [0], [0], [1], [0, 0, 1, 1], [], []>} : vector<16x32xf32>, vector<32x64xf32>, vector<16x64xf32> -> vector<16x64xf32>
    %67 = vector.broadcast %65 : vector<1x64xf32> to vector<16x64xf32>
    %68 = arith.addf %66, %67 : vector<16x64xf32>
    %69 = arith.mulf %61, %68 : vector<16x64xf32>
    %70 = arith.addf %53, %69 : vector<16x64xf32>
    %c0_37 = arith.constant 0 : index
    %c0_38 = arith.constant 0 : index
    %71 = vector.load %arg6[%c0_37, %c0_38] : memref<16x64xf32, #tpu.memory_space<vmem>>, vector<16x64xf32>
    tpu.vector_store %arg6[%c0_37, %c0_38], %70 {strides = array<i32>} : memref<16x64xf32, #tpu.memory_space<vmem>>, vector<16x64xf32>,
    return
  }
}

</mosaic_0001>

<bundles_post_ra>
// kernel: tpu_custom_call.1
= control target key start
LH: loop header
LB: loop body
LE: loop exit
PB: predicated region body
PF: predicated region fallthrough
CT: control target
= control target key end

     0   :  { %12 = vsyncpa [#allocation3], 0  ;;  %s1185_s0 = inlined_call_operand.hbm [shape: f32[16,9], index: 0, kind: input, shape index: {}]   ;;  %s1186_s1 = inlined_call_operand.hbm [shape: f32[9,32], index: 1, kind: input, shape index: {}]   ;;  %s1187_s2 = inlined_call_operand.hbm [shape: f32[16,16], index: 2, kind: input, shape index: {}]   ;;  %s1188_s3 = inlined_call_operand.hbm [shape: f32[3,16,32], index: 3, kind: input, shape index: {}]   ;;  %s1189_s4 = inlined_call_operand.hbm [shape: f32[3,33,64], index: 4, kind: input, shape index: {}]   ;;  %s1190_s5 = inlined_call_operand.hbm [shape: f32[16,32], index: 5, kind: output, shape index: {0}]   ;;  %s1191_s6 = inlined_call_operand.hbm [shape: f32[16,64], index: 6, kind: output, shape index: {1}]  }
   0x1   :  { %13 = vsyncpa [#allocation6], 0 }
   0x2   :  { %14 = vsyncpa [#allocation9], 0 }
   0x3   :  { %15 = vsyncpa [#allocation4], 0 }
   0x4   :  { %16 = vsyncpa [#allocation13], 0  ;;  %s1012_s21 = smov [#allocation5]   ;;  %s1013_s23 = smov [#allocation8]  }
   0x5   :  { %s34_s22 = sshll.u32 %s1012_s21, 4  ;;  %s58_s24 = sshll.u32 %s1013_s23, 4  ;;  %s35_s22 = int_to_ptr.vmem [resolvable:$true] %s34_s22  ;;  %s1058_s24 = int_to_ptr.vmem [resolvable:$true] %s58_s24 }
   0x6   :  { %s848_s27 = scalar_lea.hbm %s1186_s1, 256 }
   0x7   :  { %p849_p0 = scmp.ne.s32.totalorder %s1186_s1, %s848_s27  ;;  %p852_p1 = scmp.lt.u32.totalorder %s848_s27, %s1186_s1 }
   0x9   :  { %p854_p2 = pnand %p852_p1, %p849_p0 }
   0xb   :  { %857 = shalt.err (!%p854_p2)
}
   0xc   :  { %s858_s8 = scalar_lea.vmem %s35_s22, 256  ;;  %p863_p4 = scmp.lt.s32.totalorder %s35_s22, %s35_s22 }
   0xd   :  { %p859_p3 = scmp.ne.s32.totalorder %s35_s22, %s858_s8  ;;  %p864_p5 = scmp.lt.s32.totalorder %s858_s8, %s858_s8 }
   0xf   :  { %p865_p6 = por %p864_p5, %p863_p4 }
  0x11   :  { %p866_p7 = pnand %p865_p6, %p859_p3 }
  0x13   :  { %869 = shalt.err (!%p866_p7)
}
  0x14   :  { %s1014_s9 = smov 128   ;;  %s1015_s10 = smov 8  }
  0x15   :  { %40 = dma.hbm_to_vmem [thread:$0]  %s1186_s1, 256, %s35_s22, [#allocation6], %s1014_s9, %s1014_s9, %s1015_s10  }
  0x16   :  { %s870_s15 = scalar_lea.hbm %s1188_s3, 768 }
  0x17   :  { %p871_p8 = scmp.ne.s32.totalorder %s1188_s3, %s870_s15  ;;  %p874_p9 = scmp.lt.u32.totalorder %s870_s15, %s1188_s3 }
  0x19   :  { %p876_p10 = pnand %p874_p9, %p871_p8 }
  0x1b   :  { %879 = shalt.err (!%p876_p10)
}
  0x1c   :  { %s880_s20 = scalar_lea.vmem %s1058_s24, 768  ;;  %p885_p12 = scmp.lt.s32.totalorder %s1058_s24, %s1058_s24 }
  0x1d   :  { %p881_p11 = scmp.ne.s32.totalorder %s1058_s24, %s880_s20  ;;  %p886_p13 = scmp.lt.s32.totalorder %s880_s20, %s880_s20 }
  0x1f   :  { %p887_p0 = por %p886_p13, %p885_p12 }
  0x21   :  { %p888_p1 = pnand %p887_p0, %p881_p11 }
  0x23   :  { %891 = shalt.err (!%p888_p1)
}
  0x24   :  { %64 = dma.hbm_to_vmem [thread:$0]  %s1188_s3, 768, %s1058_s24, [#allocation9], %s1014_s9, %s1014_s9, %s1015_s10  }
  0x25   :  { %s1016_s22 = smov [#allocation2]   ;;  %s1017_s25 = smov [#allocation7]  }
  0x26   :  { %s22_s23 = sshll.u32 %s1016_s22, 4  ;;  %s46_s26 = sshll.u32 %s1017_s25, 4  ;;  %s23_s23 = int_to_ptr.vmem [resolvable:$true] %s22_s23  ;;  %s1095_s26 = int_to_ptr.vmem [resolvable:$true] %s46_s26 }
  0x27   :  { %s892_s29 = scalar_lea.hbm %s1185_s0, 256 }
  0x28   :  { %p893_p2 = scmp.ne.s32.totalorder %s1185_s0, %s892_s29  ;;  %p896_p3 = scmp.lt.u32.totalorder %s892_s29, %s1185_s0 }
  0x2a   :  { %p898_p4 = pnand %p896_p3, %p893_p2 }
  0x2c   :  { %901 = shalt.err (!%p898_p4)
}
  0x2d   :  { %s902_s3 = scalar_lea.vmem %s23_s23, 256  ;;  %p907_p6 = scmp.lt.s32.totalorder %s23_s23, %s23_s23 }
  0x2e   :  { %p903_p5 = scmp.ne.s32.totalorder %s23_s23, %s902_s3  ;;  %p908_p7 = scmp.lt.s32.totalorder %s902_s3, %s902_s3 }
  0x30   :  { %p909_p8 = por %p908_p7, %p907_p6 }
  0x32   :  { %p910_p9 = pnand %p909_p8, %p903_p5 }
  0x34   :  { %913 = shalt.err (!%p910_p9)
}
  0x35   :  { %28 = dma.hbm_to_vmem [thread:$0]  %s1185_s0, 256, %s23_s23, [#allocation3], %s1014_s9, %s1014_s9, %s1015_s10  }
  0x36   :  { %s914_s15 = scalar_lea.hbm %s1187_s2, 256 }
  0x37   :  { %p915_p10 = scmp.ne.s32.totalorder %s1187_s2, %s914_s15  ;;  %p918_p11 = scmp.lt.u32.totalorder %s914_s15, %s1187_s2 }
  0x39   :  { %p920_p12 = pnand %p918_p11, %p915_p10 }
  0x3b   :  { %923 = shalt.err (!%p920_p12)
}
  0x3c   :  { %s924_s20 = scalar_lea.vmem %s1095_s26, 256  ;;  %p929_p0 = scmp.lt.s32.totalorder %s1095_s26, %s1095_s26 }
  0x3d   :  { %p925_p13 = scmp.ne.s32.totalorder %s1095_s26, %s924_s20  ;;  %p930_p1 = scmp.lt.s32.totalorder %s924_s20, %s924_s20 }
  0x3f   :  { %p931_p2 = por %p930_p1, %p929_p0 }
  0x41   :  { %p932_p3 = pnand %p931_p2, %p925_p13 }
  0x43   :  { %935 = shalt.err (!%p932_p3)
}
  0x44   :  { %52 = dma.hbm_to_vmem [thread:$0]  %s1187_s2, 256, %s1095_s26, [#allocation6], %s1014_s9, %s1014_s9, %s1015_s10  }
  0x45   :  { %s1018_s21 = smov [#allocation10]   ;;  %s936_s27 = scalar_lea.hbm %s1189_s4, 1920 }
  0x46   :  { %s70_s22 = sshll.u32 %s1018_s21, 4  ;;  %p937_p4 = scmp.ne.s32.totalorder %s1189_s4, %s936_s27  ;;  %s71_s22 = int_to_ptr.vmem [resolvable:$true] %s70_s22 }
  0x47   :  { %p940_p5 = scmp.lt.u32.totalorder %s936_s27, %s1189_s4 }
  0x49   :  { %p942_p6 = pnand %p940_p5, %p937_p4 }
  0x4b   :  { %945 = shalt.err (!%p942_p6)
}
  0x4c   :  { %s946_s8 = scalar_lea.vmem %s71_s22, 1920  ;;  %p951_p8 = scmp.lt.s32.totalorder %s71_s22, %s71_s22 }
  0x4d   :  { %p947_p7 = scmp.ne.s32.totalorder %s71_s22, %s946_s8  ;;  %p952_p9 = scmp.lt.s32.totalorder %s946_s8, %s946_s8 }
  0x4f   :  { %p953_p10 = por %p952_p9, %p951_p8 }
  0x51   :  { %p954_p11 = pnand %p953_p10, %p947_p7 }
  0x53   :  { %957 = shalt.err (!%p954_p11)
}
  0x54   :  { %76 = dma.hbm_to_vmem [thread:$0]  %s1189_s4, 1920, %s71_s22, [#allocation9], %s1014_s9, %s1014_s9, %s1015_s10  }
  0x55   :  { %1002 = dma.done.wait [#allocation3], 256  }
  0x56   :  { %1003 = vsyncadd [#allocation3], 4294967040 }
  0x57   :  { %1004 = dma.done.wait [#allocation6], 512  }
  0x58   :  { %1005 = vsyncadd [#allocation6], 4294966784 }
  0x59   :  { %1006 = dma.done.wait [#allocation9], 2688  }
  0x5a   :  { %1007 = vsyncadd [#allocation9], 4294964608  ;;  %vm103_vm0 = vcmask 1040384   ;;  %vm96_vm1 = vcmask 72704   ;;  %vm1019_vm2 = vmmov 1   ;;  %v94_v0 = vld [vmem:[#allocation5] sm:$0xff] }
  0x5b   :  { %vm800_vm3 = vmpackc.low %vm103_vm0, %vm1019_vm2  ;;  %v95_v1 = vld [vmem:[#allocation5 + $0x8] sm:$0x1]  ;;  %v92_v2 = vld [vmem:[#allocation2] sm:$0xff]  ;;  %vm184_vm4 = vcmask 130048   ;;  %vm359_vm5 = vcmask 261120   ;;  %s1020_s4 = smov [#allocation11]  }
  0x5c   :  { %v799_v3 = vpack.c.bf16 %v95_v1, %v94_v0  ;;  %749 = vmatprep.mubr.msk.f32.mxu0 %vm96_vm1, %v92_v2  ;;  %v93_v4 = vld [vmem:[#allocation2 + $0x8] sm:$0xff]  ;;  %v182_v5 = vld [vmem:[#allocation7] sm:$0xff]  ;;  %v477_v17 = vld [vmem:[#allocation10 + $0x30] sm:$0xff]  ;;  %s669_s11 = sshll.u32 %s1020_s4, 4  ;;  %s670_s11 = int_to_ptr.vmem [resolvable:$true] %s669_s11 }
  0x5d   :  { %756 = vmatprep.mubr.msk.f32.mxu1 %vm184_vm4, %v182_v5  ;;  %v183_v9 = vld [vmem:[#allocation7 + $0x8] sm:$0xff]  ;;  %v373_v13 = vld [vmem:[#allocation10] sm:$0xff]  ;;  %v375_v19 = vld [vmem:[#allocation10 + $0x10] sm:$0xff]  ;;  %s958_s3 = scalar_lea.vmem %s670_s11, 256  ;;  %p963_p13 = scmp.lt.s32.totalorder %s670_s11, %s670_s11 }
  0x5e   :  { %801 = vmatprep.subr.msk.bf16.mxu0 %vm800_vm3, %v799_v3  ;;  %v374_v14 = vld [vmem:[#allocation10 + $0x8] sm:$0xff]  ;;  %v376_v20 = vld [vmem:[#allocation10 + $0x18] sm:$0xff]  ;;  %v479_v23 = vld [vmem:[#allocation10 + $0x40] sm:$0xff]  ;;  %p959_p12 = scmp.ne.s32.totalorder %s670_s11, %s958_s3  ;;  %p964_p0 = scmp.lt.s32.totalorder %s958_s3, %s958_s3 }
  0x5f   :  { %804 = vmatpush3.bf16.msk.msra.mxu0 %vm800_vm3, %v799_v3  ;;  %v813_v15 = vpack.c.bf16 %v374_v14, %v373_v13  ;;  %v476_v16 = vld [vmem:[#allocation10 + $0x28] sm:$0xff]  ;;  %v817_v21 = vpack.c.bf16 %v376_v20, %v375_v19  ;;  %v478_v22 = vld [vmem:[#allocation10 + $0x38] sm:$0xff]  ;;  %v573_v25 = vld [vmem:[#allocation10 + $0x50] sm:$0xff] }
  0x60   :  { %v821_v18 = vpack.c.bf16 %v477_v17, %v476_v16  ;;  %v825_v24 = vpack.c.bf16 %v479_v23, %v478_v22  ;;  %v574_v26 = vld [vmem:[#allocation10 + $0x58] sm:$0xff]  ;;  %v347_v29 = vld [vmem:[#allocation8 + $0x18] sm:$0xff]  ;;  %v341_v30 = vld [vmem:[#allocation8] sm:$0xff]  ;;  %p965_p1 = por %p964_p0, %p963_p13 }
  0x61   :  { %v829_v27 = vpack.c.bf16 %v574_v26, %v573_v25  ;;  %v342_v28 = vld [vmem:[#allocation8 + $0x8] sm:$0xff]  ;;  %v346_v31 = vld [vmem:[#allocation8 + $0x10] sm:$0xff]  ;;  %v353_v40 = vld [vmem:[#allocation8 + $0x20] sm:$0xff] }
  0x62   :  { %750 = vmatmul.mubr.msk.f32.vlgmr.msra.gmra.mrb[0].mxu0 %vm96_vm1, %v93_v4  ;;  %v354_v37 = vld [vmem:[#allocation8 + $0x28] sm:$0xff]  ;;  %v575_v44 = vld [vmem:[#allocation10 + $0x60] sm:$0xff]  ;;  %v576_v45 = vld [vmem:[#allocation10 + $0x68] sm:$0xff]  ;;  %p966_p2 = pnand %p965_p1, %p959_p12 }
  0x63   :  { %763 = vmatprep.mubr.msk.f32.mxu0 %vm184_vm4, %v182_v5  ;;  %v833_v48 = vpack.c.bf16 %v576_v45, %v575_v44 }
 0x135   :  { %v751_v6 = vpop.f32.mrb[0].mxu0 }
 0x136   :  { %v173_v7 = vpop.f32.mrb[1].mxu0 }
 0x137   :  { %v805_v8 = vpack.c.bf16 %v751_v6, %v173_v7 }
 0x139   :  { %806 = vmatprep.subr.bf16.mxu1 %v805_v8 }
 0x13a   :  { %808 = vmatpush3.bf16.msra.mxu1 %v805_v8 }
 0x13b   :  { %814 = vmatprep.subr.bf16.mxu1 %v813_v15 }
 0x13d   :  { %757 = vmatmul.mubr.msk.f32.vlgmr.msra.gmra.mrb[0].mxu1 %vm184_vm4, %v183_v9 }
 0x13e   :  { %816 = vmatpush3.bf16.msra.mxu1 %v813_v15 }
 0x13f   :  { %818 = vmatprep.subr.bf16.mxu1 %v817_v21 }
 0x142   :  { %820 = vmatpush3.bf16.msra.mxu1 %v817_v21 }
 0x143   :  { %830 = vmatprep.subr.bf16.mxu1 %v829_v27 }
 0x210   :  { %v758_v10 = vpop.f32.mrb[0].mxu1 }
 0x211   :  { %v257_v11 = vpop.f32.mrb[1].mxu1  ;;  %v344_v33 = vmul.f32 %v758_v10, %v342_v28 }
 0x212   :  { %v809_v12 = vpack.c.bf16 %v758_v10, %v257_v11  ;;  %v343_v36 = vmul.f32 %v341_v30, %v257_v11 }
 0x214   :  { %810 = vmatprep.subr.bf16.mxu0 %v809_v12 }
 0x215   :  { %812 = vmatpush3.bf16.msra.mxu0 %v809_v12 }
 0x216   :  { %822 = vmatprep.subr.bf16.mxu0 %v821_v18 }
 0x218   :  { %764 = vmatmul.mubr.msk.f32.vlgmr.msra.gmra.mrb[2].mxu0 %vm184_vm4, %v183_v9 }
 0x219   :  { %824 = vmatpush3.bf16.msra.mxu0 %v821_v18 }
 0x21a   :  { %826 = vmatprep.subr.bf16.mxu0 %v825_v24 }
 0x21d   :  { %828 = vmatpush3.bf16.msra.mxu0 %v825_v24 }
 0x2eb   :  { %v765_v32 = vpop.f32.mrb[2].mxu0 }
 0x2ec   :  { %v349_v34 = vmul.f32 %v765_v32, %v347_v29  ;;  %v332_v35 = vpop.f32.mrb[3].mxu0 }
 0x2ed   :  { %v348_v38 = vmul.f32 %v346_v31, %v332_v35 }
 0x2ee   :  { %v351_v39 = vadd.f32 %v349_v34, %v344_v33 }
 0x2ef   :  { %v350_v41 = vadd.f32 %v348_v38, %v343_v36 }
 0x2f0   :  { %v356_v42 = vadd.f32 %v354_v37, %v351_v39 }
 0x2f1   :  { %v355_v43 = vadd.f32 %v353_v40, %v350_v41 }
 0x2f2   :  { %v358_v46 = vadd.f32 %v751_v6, %v356_v42 }
 0x2f3   :  { %v357_v47 = vadd.f32 %v355_v43, %v173_v7 }
 0x2f4   :  { %361 = vst.msk [vmem:[#allocation11 + $0x8] sm:$0xff] %vm359_vm5, %v358_v46 }
 0x2f5   :  { %774 = vmatprep.mubr.msk.f32.mxu1 %vm359_vm5, %v357_v47  ;;  %360 = vst.msk [vmem:[#allocation11] sm:$0xff] %vm359_vm5, %v357_v47  ;;  %785 = vmatprep.mubr.msk.f32.mxu0 %vm359_vm5, %v357_v47 }
 0x2f6   :  { %775 = vmatmul.mubr.msk.f32.vlgmr.msra.gmra.mrb[2].mxu1 %vm359_vm5, %v358_v46  ;;  %786 = vmatmul.mubr.msk.f32.vlgmr.msra.gmra.mrb[4].mxu0 %vm359_vm5, %v358_v46 }
 0x2f7   :  { %832 = vmatpush3.bf16.msra.mxu1 %v829_v27  ;;  %796 = vmatprep.mubr.msk.f32.mxu1 %vm359_vm5, %v357_v47 }
 0x2f8   :  { %834 = vmatprep.subr.bf16.mxu1 %v833_v48 }
 0x2fb   :  { %836 = vmatpush3.bf16.msra.mxu1 %v833_v48 }
 0x2fe   :  { %797 = vmatmul.mubr.msk.f32.vlgmr.msra.gmra.mrb[4].mxu1 %vm359_vm5, %v358_v46 }
 0x2ff   :  { %969 = shalt.err (!%p966_p2)
}
 0x300   :  { %s970_s13 = scalar_lea.hbm %s1190_s5, 256 }
 0x301   :  { %p971_p3 = scmp.ne.s32.totalorder %s1190_s5, %s970_s13  ;;  %p974_p4 = scmp.lt.u32.totalorder %s970_s13, %s1190_s5 }
 0x303   :  { %p976_p5 = pnand %p974_p4, %p971_p3 }
 0x305   :  { %979 = shalt.err (!%p976_p5)
}
 0x306   :  { %675 = dma.vmem_to_hbm [thread:$0]  %s670_s11, 256, %s1190_s5, [#allocation4], %s1014_s9, %s1014_s9, %s1015_s10   ;;  %v362_v49 = vlaneseq  ;;  %v706_v52 = vld [vmem:[#allocation10 + $0x20] ss:$0 sm:$0xff]  ;;  %v709_v53 = vld [vmem:[#allocation10 + $0x48] ss:$0 sm:$0xff] }
 0x307   :  { %v1021_v55 = vmov 0.0   ;;  %v712_v8 = vld [vmem:[#allocation10 + $0x70] ss:$0 sm:$0xff]  ;;  %s1022_s5 = smov [#allocation12]   ;;  %vm661_vm10 = vcmask 523264  }
 0x308   :  { %v363_v50 = vshrl.u32 %v362_v49, 7  ;;  %s681_s20 = sshll.u32 %s1022_s5, 4  ;;  %s682_s20 = int_to_ptr.vmem [resolvable:$true] %s681_s20 }
 0x309   :  { %s980_s0 = scalar_lea.vmem %s682_s20, 256  ;;  %p985_p7 = scmp.lt.s32.totalorder %s682_s20, %s682_s20 }
 0x30a   :  { %v364_v51 = vadd.s32 8, %v363_v50  ;;  %vm367_vm7 = vcmp.lt.s32.totalorder %v363_v50, 6  ;;  %vm467_vm8 = vcmp.ge.s32.totalorder %v363_v50, 6  ;;  %p981_p6 = scmp.ne.s32.totalorder %s682_s20, %s980_s0  ;;  %p986_p8 = scmp.lt.s32.totalorder %s980_s0, %s980_s0 }
 0x30b   :  { %v371_v60 = vsel %vm367_vm7, 1.0, %v1021_v55  ;;  %v473_v62 = vsel %vm467_vm8, 1.0, %v1021_v55 }
 0x30c   :  { %vm470_vm6 = vcmp.lt.s32.totalorder %v364_v51, 11  ;;  %vm565_vm9 = vcmp.ge.s32.totalorder %v364_v51, 11  ;;  %p987_p9 = por %p986_p8, %p985_p7 }
 0x30d   :  { %v474_v56 = vsel %vm470_vm6, 1.0, %v1021_v55  ;;  %v571_v9 = vsel %vm565_vm9, 1.0, %v1021_v55 }
 0x30e   :  { %p988_p10 = pnand %p987_p9, %p981_p6 }
 0x3c9   :  { %v776_v54 = vpop.f32.mrb[2].mxu1  ;;  %v787_v57 = vpop.f32.mrb[4].mxu0 }
 0x3ca   :  { %v460_v58 = vadd.f32 %v776_v54, %v706_v52  ;;  %v557_v59 = vadd.f32 %v787_v57, %v709_v53  ;;  %v454_v61 = vpop.f32.mrb[3].mxu1  ;;  %v551_v63 = vpop.f32.mrb[5].mxu0 }
 0x3cb   :  { %v455_v0 = vadd.f32 %v706_v52, %v454_v61  ;;  %v552_v1 = vadd.f32 %v709_v53, %v551_v63 }
 0x3cc   :  { %v464_v2 = vmul.f32 0.0, %v460_v58  ;;  %v561_v3 = vmul.f32 %v557_v59, %v474_v56 }
 0x3cd   :  { %v463_v4 = vmul.f32 %v455_v0, %v371_v60  ;;  %v560_v5 = vmul.f32 %v552_v1, %v473_v62 }
 0x3ce   :  { %v563_v6 = vadd.f32 %v561_v3, %v464_v2 }
 0x3cf   :  { %v562_v7 = vadd.f32 %v560_v5, %v463_v4 }
 0x3d1   :  { %v798_v10 = vpop.f32.mrb[4].mxu1 }
 0x3d2   :  { %v654_v11 = vadd.f32 %v798_v10, %v712_v8  ;;  %v648_v12 = vpop.f32.mrb[5].mxu1 }
 0x3d3   :  { %v649_v13 = vadd.f32 %v712_v8, %v648_v12 }
 0x3d4   :  { %v658_v14 = vmul.f32 %v654_v11, %v571_v9 }
 0x3d5   :  { %v657_v15 = vmul.f32 0.0, %v649_v13 }
 0x3d6   :  { %v660_v16 = vadd.f32 %v658_v14, %v563_v6 }
 0x3d7   :  { %v659_v17 = vadd.f32 %v657_v15, %v562_v7 }
 0x3d8   :  { %663 = vst.msk [vmem:[#allocation12 + $0x8] sm:$0xff] %vm661_vm10, %v660_v16 }
 0x3d9   :  { %662 = vst.msk [vmem:[#allocation12] sm:$0xff] %vm661_vm10, %v659_v17 }
 0x3da   :  { %991 = shalt.err (!%p988_p10)
}
 0x3db   :  { %s992_s22 = scalar_lea.hbm %s1191_s6, 256 }
 0x3dc   :  { %p993_p11 = scmp.ne.s32.totalorder %s1191_s6, %s992_s22  ;;  %p996_p12 = scmp.lt.u32.totalorder %s992_s22, %s1191_s6 }
 0x3de   :  { %p998_p13 = pnand %p996_p12, %p993_p11 }
 0x3e0   :  { %1001 = shalt.err (!%p998_p13)
}
 0x3e1   :  { %687 = dma.vmem_to_hbm [thread:$0]  %s682_s20, 256, %s1191_s6, [#allocation13], %s1014_s9, %s1014_s9, %s1015_s10  }
 0x3e2   :  { %1008 = dma.done.wait [#allocation4], 256  }
 0x3e3   :  { %1009 = vsyncadd [#allocation4], 4294967040 }
 0x3e4   :  { %1010 = dma.done.wait [#allocation13], 256  }
 0x3e5   :  { %1011 = vsyncadd [#allocation13], 4294967040 }
 0x3e6   :  { %694 = vsyncpa [#allocation3], 1 }
 0x3e7   :  { %695 = vsyncpa [#allocation6], 1 }
 0x3e8   :  { %696 = vsyncpa [#allocation9], 1 }
 0x3e9   :  { %697 = vsyncpa [#allocation4], 1 }
 0x3ea   :  { %698 = vsyncpa [#allocation13], 1 }

</bundles_post_ra>
